<compile_context>
chip_gen: v7x
topology: tpu7x:2x2x1
jax: 0.10.0
libtpu: 0.0.40
codegen_flags: <defaults>
</compile_context>

<pallas_src>
import functools

import jax
import jax.numpy as jnp
from jax.experimental import pallas as pl
from jax.experimental.pallas import tpu as pltpu

THRESHOLD = 1.0 - 0.1  # self.threshold in the module


def _pick_tile_s(S, H):
    """Largest seq-tile that divides S, is a multiple of 128 (lane-dense stats
    stores, aligned blocks) and keeps one [TILE_S, H] f32 tile <= ~4 MiB so the
    double-buffered working set stays well inside VMEM (64 MiB on v7x)."""
    budget = 4 * 1024 * 1024
    for t in (2048, 1024, 512, 256, 128):
        if S % t == 0 and t * H * 4 <= budget:
            return t
    return S  # small / awkward S: one full-sequence block


def _act_kernel(state_ref, time_ref, pos_ref, wp_ref, wfn_ref, bfn_ref, bp_ref,
                prev_ref, stats_ref, *, max_hop, threshold):
    T, H = state_ref.shape

    state = state_ref[...]                              # [T, H] f32
    time_enc = time_ref[...]                            # [T, H] f32
    wfn = wfn_ref[...]                                  # [H, H] bf16
    bp = bp_ref[0]                                      # scalar (SMEM)

    # Hoist broadcasts out of the unrolled loop (JAX does not CSE
    # broadcast_in_dim).
    wp_b = jnp.broadcast_to(wp_ref[...], (T, H))        # [T, H]
    bfn_b = jnp.broadcast_to(bfn_ref[...], (T, H))      # [T, H]

    halting = jnp.zeros((T, 1), jnp.float32)
    rem = jnp.zeros((T, 1), jnp.float32)
    nup = jnp.zeros((T, 1), jnp.float32)
    prev = jnp.zeros((T, H), jnp.float32)               # local accumulator

    # Static unroll: max_hop is a small compile-time constant, so pos_enc
    # slicing is static and the MXU matmul / VPU halting math / DMA overlap.
    for step in range(max_hop):
        pos_row = pos_ref[step:step + 1, :]             # [1, H], static slice
        state = state + time_enc + pos_row

        # Halting projection on the VPU/XLU (no MXU pass for a 1-wide output).
        logits = jnp.sum(state * wp_b, axis=-1, keepdims=True) + bp
        p = jax.nn.sigmoid(logits)                      # [T, 1] f32

        still = (halting < 1.0).astype(jnp.float32)
        cand = halting + p * still
        new_halted = (cand > threshold).astype(jnp.float32) * still
        still = (cand <= threshold).astype(jnp.float32) * still
        halting = halting + p * still
        rem = rem + new_halted * (1.0 - halting)
        halting = halting + new_halted * rem
        nup = nup + still + new_halted
        uw = p * still + new_halted * rem               # update_weights [T, 1]

        # Transition fn: Linear(H, H) + ReLU.  bf16 operands, f32 accumulation.
        state = jnp.maximum(
            jnp.dot(state.astype(wfn.dtype), wfn,
                    preferred_element_type=jnp.float32) + bfn_b,
            0.0)

        # previous_state = prev + uw * (state - prev)   (one fewer T*H multiply)
        prev = prev + uw * (state - prev)

    prev_ref[...] = prev                                # single output store

    # Lane-dense stats write-back: tokens land on the lane axis.
    stats_ref[0:1, :] = jnp.transpose(rem)              # remainders row
    stats_ref[1:2, :] = jnp.transpose(nup)              # n_updates row


def act_basic_forward(state, inputs, time_enc, pos_enc, max_hop,
                      w_p, b_p, w_fn, b_fn, *, transition_dtype=jnp.bfloat16):
    """ACT_basic.forward (decoding=False).

    state, inputs : [B, S, H]
    time_enc      : [1, S_max, H]  (first S rows used)
    pos_enc       : [1, max_hop, H]
    Returns (previous_state [B,S,H], (remainders [B,S], n_updates [B,S])).
    """
    B, S, H = inputs.shape
    max_hop = int(max_hop)

    state3 = state.astype(jnp.float32)                       # [B, S, H]
    time2 = time_enc[0, :S, :].astype(jnp.float32)           # [S, H] (no batch bcast)
    pos2 = pos_enc[0, :max_hop, :].astype(jnp.float32)       # [max_hop, H]
    wp_row = w_p.reshape(1, H).astype(jnp.float32)           # [1, H] lane-dense
    bp = b_p.reshape(1).astype(jnp.float32)                  # SMEM scalar
    wfn = w_fn.astype(transition_dtype)                      # [H, H] bf16
    bfn = b_fn.reshape(1, H).astype(jnp.float32)             # [1, H]

    tile_s = _pick_tile_s(S, H)
    n_s_tiles = S // tile_s
    grid = (B, n_s_tiles)

    kernel = functools.partial(_act_kernel, max_hop=max_hop, threshold=THRESHOLD)

    cost = pl.CostEstimate(
        flops=2 * max_hop * B * S * H * H + 2 * max_hop * B * S * H,
        transcendentals=max_hop * B * S,
        bytes_accessed=2 * B * S * H * 4 + S * H * 4 + H * H * 2 + B * 2 * S * 4,
    )

    prev, stats = pl.pallas_call(
        kernel,
        grid=grid,
        in_specs=[
            pl.BlockSpec((None, tile_s, H), lambda b, s: (b, s, 0)),   # state
            pl.BlockSpec((tile_s, H), lambda b, s: (s, 0)),            # time (shared over batch)
            pl.BlockSpec((max_hop, H), lambda b, s: (0, 0)),           # pos_enc (resident)
            pl.BlockSpec((1, H), lambda b, s: (0, 0)),                 # w_p row
            pl.BlockSpec((H, H), lambda b, s: (0, 0)),                 # w_fn (bf16, resident)
            pl.BlockSpec((1, H), lambda b, s: (0, 0)),                 # b_fn
            pl.BlockSpec(memory_space=pltpu.MemorySpace.SMEM),         # b_p scalar
        ],
        out_specs=[
            pl.BlockSpec((None, tile_s, H), lambda b, s: (b, s, 0)),   # previous_state
            pl.BlockSpec((None, 2, tile_s), lambda b, s: (b, 0, s)),   # [rem; nup] lane-dense
        ],
        out_shape=[
            jax.ShapeDtypeStruct((B, S, H), jnp.float32),
            jax.ShapeDtypeStruct((B, 2, S), jnp.float32),
        ],
        compiler_params=pltpu.CompilerParams(
            dimension_semantics=("parallel", "parallel"),
            vmem_limit_bytes=48 * 1024 * 1024),
        cost_estimate=cost,
    )(state3, time2, pos2, wp_row, wfn, bfn, bp)

    remainders = stats[:, 0, :]
    n_updates = stats[:, 1, :]
    return prev, (remainders, n_updates)


def act_basic_reference(state, inputs, time_enc, pos_enc, max_hop,
                        w_p, b_p, w_fn, b_fn, *, transition_dtype=jnp.bfloat16):
    """Pure-JAX reference mirroring the PyTorch loop (decoding=False).

    The transition Linear(H,H) is evaluated with the same operand precision as
    the kernel (bf16 operands, f32 accumulation) so halting decisions match;
    the original module's fn is external, so its precision is ours to choose.
    """
    B, S, H = inputs.shape
    halting = jnp.zeros((B, S), jnp.float32)
    rem = jnp.zeros((B, S), jnp.float32)
    nup = jnp.zeros((B, S), jnp.float32)
    prev = jnp.zeros((B, S, H), jnp.float32)
    state = state.astype(jnp.float32)
    w_fn_c = w_fn.astype(transition_dtype)
    wp_row = w_p.reshape(1, 1, H).astype(jnp.float32)

    for step in range(int(max_hop)):
        state = state + time_enc[:, :S, :].astype(jnp.float32)
        state = state + pos_enc[:, step, :][:, None, :].astype(jnp.float32)
        p = jax.nn.sigmoid(jnp.sum(state * wp_row, axis=-1) + b_p[0])
        still = (halting < 1.0).astype(jnp.float32)
        cand = halting + p * still
        new_halted = (cand > THRESHOLD).astype(jnp.float32) * still
        still = (cand <= THRESHOLD).astype(jnp.float32) * still
        halting = halting + p * still
        rem = rem + new_halted * (1.0 - halting)
        halting = halting + new_halted * rem
        nup = nup + still + new_halted
        uw = p * still + new_halted * rem
        state = jnp.maximum(
            jnp.einsum("bsh,hk->bsk", state.astype(transition_dtype), w_fn_c,
                       preferred_element_type=jnp.float32)
            + b_fn.reshape(1, 1, H).astype(jnp.float32),
            0.0)
        prev = prev + uw[..., None] * (state - prev)
    return prev, (rem, nup)


if __name__ == "__main__":
    B, S, H = 2, 8, 32
    MAX_HOP = 4

    key = jax.random.PRNGKey(0)
    k1, k2, k3, k4, k5, k6, k7 = jax.random.split(key, 7)

    inputs = jax.random.normal(k1, (B, S, H), jnp.float32)
    state = jax.random.normal(k2, (B, S, H), jnp.float32)
    time_enc = 0.1 * jax.random.normal(k3, (1, S, H), jnp.float32)
    pos_enc = 0.1 * jax.random.normal(k4, (1, MAX_HOP, H), jnp.float32)

    # ACT_basic parameters: p = Linear(hidden_size, 1), bias filled with 1.
    w_p = 0.1 * jax.random.normal(k5, (H, 1), jnp.float32)
    b_p = jnp.ones((1,), jnp.float32)
    # Transition function fn parameters (Linear(H, H) + ReLU), deterministic.
    w_fn = (1.0 / jnp.sqrt(H)) * jax.random.normal(k6, (H, H), jnp.float32)
    b_fn = 0.01 * jax.random.normal(k7, (H,), jnp.float32)

    prev, (rem, nup) = act_basic_forward(
        state, inputs, time_enc, pos_enc, MAX_HOP, w_p, b_p, w_fn, b_fn)
    prev = jax.block_until_ready(prev)
    rem = jax.block_until_ready(rem)
    nup = jax.block_until_ready(nup)

    prev_r, (rem_r, nup_r) = act_basic_reference(
        state, inputs, time_enc, pos_enc, MAX_HOP, w_p, b_p, w_fn, b_fn)

    assert jnp.allclose(prev, prev_r, rtol=2e-2, atol=2e-2), "previous_state mismatch"
    assert jnp.allclose(rem, rem_r, rtol=1e-2, atol=1e-2), "remainders mismatch"
    assert jnp.allclose(nup, nup_r, rtol=1e-2, atol=1e-2), "n_updates mismatch"

    print("KERNEL_OK")
</pallas_src>

<mosaic_0001>
module attributes {stable_mosaic.version = 11 : i64} {
  func.func @_act_kernel(%arg0: i32, %arg1: i32, %arg2: memref<1x8x32xf32, #tpu.memory_space<vmem>>, %arg3: memref<8x32xf32, #tpu.memory_space<vmem>>, %arg4: memref<4x32xf32, #tpu.memory_space<vmem>>, %arg5: memref<1x32xf32, #tpu.memory_space<vmem>>, %arg6: memref<32x32xbf16, #tpu.memory_space<vmem>>, %arg7: memref<1x32xf32, #tpu.memory_space<vmem>>, %arg8: memref<1xf32, #tpu.memory_space<smem>>, %arg9: memref<1x8x32xf32, #tpu.memory_space<vmem>>, %arg10: memref<1x2x8xf32, #tpu.memory_space<vmem>>) attributes {dimension_semantics = [#tpu.dimension_semantics<parallel>, #tpu.dimension_semantics<parallel>], iteration_bounds = array<i64: 2, 1>, scalar_prefetch = 0 : i64, scratch_operands = 0 : i64, tpu.core_type = #tpu.core_type<tc>, window_params = [{transform_indices = @transform_0, window_bounds = array<i64: 1, 8, 32>}, {transform_indices = @transform_1, window_bounds = array<i64: 8, 32>}, {pipeline_mode = #tpu.pipeline_mode<synchronous>, transform_indices = @transform_2, window_bounds = array<i64: 4, 32>}, {pipeline_mode = #tpu.pipeline_mode<synchronous>, transform_indices = @transform_3, window_bounds = array<i64: 1, 32>}, {pipeline_mode = #tpu.pipeline_mode<synchronous>, transform_indices = @transform_4, window_bounds = array<i64: 32, 32>}, {pipeline_mode = #tpu.pipeline_mode<synchronous>, transform_indices = @transform_5, window_bounds = array<i64: 1, 32>}, {transform_indices = @transform_6, window_bounds = array<i64: 1>}, {transform_indices = @transform_7, window_bounds = array<i64: 1, 8, 32>}, {transform_indices = @transform_8, window_bounds = array<i64: 1, 2, 8>}]} {
    %c0 = arith.constant 0 : index
    %c0_0 = arith.constant 0 : index
    %c0_1 = arith.constant 0 : index
    %0 = vector.load %arg2[%c0, %c0_0, %c0_1] : memref<1x8x32xf32, #tpu.memory_space<vmem>>, vector<1x8x32xf32>
    %1 = vector.shape_cast %0 : vector<1x8x32xf32> to vector<8x32xf32>
    %c0_2 = arith.constant 0 : index
    %c0_3 = arith.constant 0 : index
    %2 = vector.load %arg3[%c0_2, %c0_3] : memref<8x32xf32, #tpu.memory_space<vmem>>, vector<8x32xf32>
    %c0_4 = arith.constant 0 : index
    %c0_5 = arith.constant 0 : index
    %3 = vector.load %arg6[%c0_4, %c0_5] : memref<32x32xbf16, #tpu.memory_space<vmem>>, vector<32x32xbf16>
    %c0_6 = arith.constant 0 : index
    %4 = memref.load %arg8[%c0_6] : memref<1xf32, #tpu.memory_space<smem>>
    %c0_7 = arith.constant 0 : index
    %c0_8 = arith.constant 0 : index
    %5 = vector.load %arg5[%c0_7, %c0_8] : memref<1x32xf32, #tpu.memory_space<vmem>>, vector<1x32xf32>
    %6 = vector.shape_cast %5 : vector<1x32xf32> to vector<1x32xf32>
    %7 = vector.broadcast %6 : vector<1x32xf32> to vector<8x32xf32>
    %c0_9 = arith.constant 0 : index
    %c0_10 = arith.constant 0 : index
    %8 = vector.load %arg7[%c0_9, %c0_10] : memref<1x32xf32, #tpu.memory_space<vmem>>, vector<1x32xf32>
    %9 = vector.shape_cast %8 : vector<1x32xf32> to vector<1x32xf32>
    %10 = vector.broadcast %9 : vector<1x32xf32> to vector<8x32xf32>
    %cst = arith.constant 0.000000e+00 : f32
    %11 = vector.broadcast %cst : f32 to vector<8x1xf32>
    %cst_11 = arith.constant 0.000000e+00 : f32
    %12 = vector.broadcast %cst_11 : f32 to vector<8x1xf32>
    %cst_12 = arith.constant 0.000000e+00 : f32
    %13 = vector.broadcast %cst_12 : f32 to vector<8x1xf32>
    %cst_13 = arith.constant 0.000000e+00 : f32
    %14 = vector.broadcast %cst_13 : f32 to vector<8x32xf32>
    %c0_14 = arith.constant 0 : index
    %c0_15 = arith.constant 0 : index
    %15 = vector.load %arg4[%c0_14, %c0_15] : memref<4x32xf32, #tpu.memory_space<vmem>>, vector<1x32xf32>
    %16 = arith.addf %1, %2 : vector<8x32xf32>
    %17 = vector.broadcast %15 : vector<1x32xf32> to vector<8x32xf32>
    %18 = arith.addf %16, %17 : vector<8x32xf32>
    %19 = arith.mulf %18, %7 : vector<8x32xf32>
    %cst_16 = arith.constant dense<0.000000e+00> : vector<8xf32>
    %20 = vector.multi_reduction <add>, %19, %cst_16 [1] : vector<8x32xf32> to vector<8xf32>
    %21 = vector.shape_cast %20 : vector<8xf32> to vector<8x1xf32>
    %22 = vector.broadcast %4 : f32 to vector<8x1xf32>
    %23 = arith.addf %21, %22 : vector<8x1xf32>
    %24 = arith.negf %23 : vector<8x1xf32>
    %25 = math.exp %24 : vector<8x1xf32>
    %cst_17 = arith.constant 1.000000e+00 : f32
    %26 = vector.broadcast %cst_17 : f32 to vector<8x1xf32>
    %27 = arith.addf %26, %25 : vector<8x1xf32>
    %28 = arith.divf %26, %27 : vector<8x1xf32>
    %cst_18 = arith.constant 1.000000e+00 : f32
    %29 = vector.broadcast %cst_18 : f32 to vector<8x1xf32>
    %30 = arith.cmpf olt, %11, %29 : vector<8x1xf32>
    %31 = arith.extui %30 : vector<8x1xi1> to vector<8x1xi32>
    %32 = arith.sitofp %31 : vector<8x1xi32> to vector<8x1xf32>
    %33 = arith.mulf %28, %32 : vector<8x1xf32>
    %34 = arith.addf %11, %33 : vector<8x1xf32>
    %cst_19 = arith.constant 0.899999976 : f32
    %35 = vector.broadcast %cst_19 : f32 to vector<8x1xf32>
    %36 = arith.cmpf ogt, %34, %35 : vector<8x1xf32>
    %37 = arith.extui %36 : vector<8x1xi1> to vector<8x1xi32>
    %38 = arith.sitofp %37 : vector<8x1xi32> to vector<8x1xf32>
    %39 = arith.mulf %38, %32 : vector<8x1xf32>
    %cst_20 = arith.constant 0.899999976 : f32
    %40 = vector.broadcast %cst_20 : f32 to vector<8x1xf32>
    %41 = arith.cmpf ole, %34, %40 : vector<8x1xf32>
    %42 = arith.extui %41 : vector<8x1xi1> to vector<8x1xi32>
    %43 = arith.sitofp %42 : vector<8x1xi32> to vector<8x1xf32>
    %44 = arith.mulf %43, %32 : vector<8x1xf32>
    %45 = arith.mulf %28, %44 : vector<8x1xf32>
    %46 = arith.addf %11, %45 : vector<8x1xf32>
    %cst_21 = arith.constant 1.000000e+00 : f32
    %47 = vector.broadcast %cst_21 : f32 to vector<8x1xf32>
    %48 = arith.subf %47, %46 : vector<8x1xf32>
    %49 = arith.mulf %39, %48 : vector<8x1xf32>
    %50 = arith.addf %12, %49 : vector<8x1xf32>
    %51 = arith.mulf %39, %50 : vector<8x1xf32>
    %52 = arith.addf %46, %51 : vector<8x1xf32>
    %53 = arith.addf %13, %44 : vector<8x1xf32>
    %54 = arith.addf %53, %39 : vector<8x1xf32>
    %55 = arith.mulf %28, %44 : vector<8x1xf32>
    %56 = arith.mulf %39, %50 : vector<8x1xf32>
    %57 = arith.addf %55, %56 : vector<8x1xf32>
    %58 = arith.truncf %18 : vector<8x32xf32> to vector<8x32xbf16>
    %cst_22 = arith.constant dense<0.000000e+00> : vector<8x32xf32>
    %59 = tpu.matmul %58, %3, %cst_22 {dimension_numbers = #tpu.dot_dimension_numbers<[1], [0], [0], [1], [0, 0, 1, 1], [], []>} : vector<8x32xbf16>, vector<32x32xbf16>, vector<8x32xf32> -> vector<8x32xf32>
    %60 = arith.addf %59, %10 : vector<8x32xf32>
    %cst_23 = arith.constant 0.000000e+00 : f32
    %61 = vector.broadcast %cst_23 : f32 to vector<8x32xf32>
    %62 = arith.maximumf %60, %61 : vector<8x32xf32>
    %63 = arith.subf %62, %14 : vector<8x32xf32>
    %64 = vector.broadcast %57 : vector<8x1xf32> to vector<8x32xf32>
    %65 = arith.mulf %64, %63 : vector<8x32xf32>
    %66 = arith.addf %14, %65 : vector<8x32xf32>
    %c1 = arith.constant 1 : index
    %c0_24 = arith.constant 0 : index
    %67 = vector.load %arg4[%c1, %c0_24] : memref<4x32xf32, #tpu.memory_space<vmem>>, vector<1x32xf32>
    %68 = arith.addf %62, %2 : vector<8x32xf32>
    %69 = vector.broadcast %67 : vector<1x32xf32> to vector<8x32xf32>
    %70 = arith.addf %68, %69 : vector<8x32xf32>
    %71 = arith.mulf %70, %7 : vector<8x32xf32>
    %cst_25 = arith.constant dense<0.000000e+00> : vector<8xf32>
    %72 = vector.multi_reduction <add>, %71, %cst_25 [1] : vector<8x32xf32> to vector<8xf32>
    %73 = vector.shape_cast %72 : vector<8xf32> to vector<8x1xf32>
    %74 = vector.broadcast %4 : f32 to vector<8x1xf32>
    %75 = arith.addf %73, %74 : vector<8x1xf32>
    %76 = arith.negf %75 : vector<8x1xf32>
    %77 = math.exp %76 : vector<8x1xf32>
    %cst_26 = arith.constant 1.000000e+00 : f32
    %78 = vector.broadcast %cst_26 : f32 to vector<8x1xf32>
    %79 = arith.addf %78, %77 : vector<8x1xf32>
    %80 = arith.divf %78, %79 : vector<8x1xf32>
    %cst_27 = arith.constant 1.000000e+00 : f32
    %81 = vector.broadcast %cst_27 : f32 to vector<8x1xf32>
    %82 = arith.cmpf olt, %52, %81 : vector<8x1xf32>
    %83 = arith.extui %82 : vector<8x1xi1> to vector<8x1xi32>
    %84 = arith.sitofp %83 : vector<8x1xi32> to vector<8x1xf32>
    %85 = arith.mulf %80, %84 : vector<8x1xf32>
    %86 = arith.addf %52, %85 : vector<8x1xf32>
    %cst_28 = arith.constant 0.899999976 : f32
    %87 = vector.broadcast %cst_28 : f32 to vector<8x1xf32>
    %88 = arith.cmpf ogt, %86, %87 : vector<8x1xf32>
    %89 = arith.extui %88 : vector<8x1xi1> to vector<8x1xi32>
    %90 = arith.sitofp %89 : vector<8x1xi32> to vector<8x1xf32>
    %91 = arith.mulf %90, %84 : vector<8x1xf32>
    %cst_29 = arith.constant 0.899999976 : f32
    %92 = vector.broadcast %cst_29 : f32 to vector<8x1xf32>
    %93 = arith.cmpf ole, %86, %92 : vector<8x1xf32>
    %94 = arith.extui %93 : vector<8x1xi1> to vector<8x1xi32>
    %95 = arith.sitofp %94 : vector<8x1xi32> to vector<8x1xf32>
    %96 = arith.mulf %95, %84 : vector<8x1xf32>
    %97 = arith.mulf %80, %96 : vector<8x1xf32>
    %98 = arith.addf %52, %97 : vector<8x1xf32>
    %cst_30 = arith.constant 1.000000e+00 : f32
    %99 = vector.broadcast %cst_30 : f32 to vector<8x1xf32>
    %100 = arith.subf %99, %98 : vector<8x1xf32>
    %101 = arith.mulf %91, %100 : vector<8x1xf32>
    %102 = arith.addf %50, %101 : vector<8x1xf32>
    %103 = arith.mulf %91, %102 : vector<8x1xf32>
    %104 = arith.addf %98, %103 : vector<8x1xf32>
    %105 = arith.addf %54, %96 : vector<8x1xf32>
    %106 = arith.addf %105, %91 : vector<8x1xf32>
    %107 = arith.mulf %80, %96 : vector<8x1xf32>
    %108 = arith.mulf %91, %102 : vector<8x1xf32>
    %109 = arith.addf %107, %108 : vector<8x1xf32>
    %110 = arith.truncf %70 : vector<8x32xf32> to vector<8x32xbf16>
    %cst_31 = arith.constant dense<0.000000e+00> : vector<8x32xf32>
    %111 = tpu.matmul %110, %3, %cst_31 {dimension_numbers = #tpu.dot_dimension_numbers<[1], [0], [0], [1], [0, 0, 1, 1], [], []>} : vector<8x32xbf16>, vector<32x32xbf16>, vector<8x32xf32> -> vector<8x32xf32>
    %112 = arith.addf %111, %10 : vector<8x32xf32>
    %cst_32 = arith.constant 0.000000e+00 : f32
    %113 = vector.broadcast %cst_32 : f32 to vector<8x32xf32>
    %114 = arith.maximumf %112, %113 : vector<8x32xf32>
    %115 = arith.subf %114, %66 : vector<8x32xf32>
    %116 = vector.broadcast %109 : vector<8x1xf32> to vector<8x32xf32>
    %117 = arith.mulf %116, %115 : vector<8x32xf32>
    %118 = arith.addf %66, %117 : vector<8x32xf32>
    %c2 = arith.constant 2 : index
    %c0_33 = arith.constant 0 : index
    %119 = vector.load %arg4[%c2, %c0_33] : memref<4x32xf32, #tpu.memory_space<vmem>>, vector<1x32xf32>
    %120 = arith.addf %114, %2 : vector<8x32xf32>
    %121 = vector.broadcast %119 : vector<1x32xf32> to vector<8x32xf32>
    %122 = arith.addf %120, %121 : vector<8x32xf32>
    %123 = arith.mulf %122, %7 : vector<8x32xf32>
    %cst_34 = arith.constant dense<0.000000e+00> : vector<8xf32>
    %124 = vector.multi_reduction <add>, %123, %cst_34 [1] : vector<8x32xf32> to vector<8xf32>
    %125 = vector.shape_cast %124 : vector<8xf32> to vector<8x1xf32>
    %126 = vector.broadcast %4 : f32 to vector<8x1xf32>
    %127 = arith.addf %125, %126 : vector<8x1xf32>
    %128 = arith.negf %127 : vector<8x1xf32>
    %129 = math.exp %128 : vector<8x1xf32>
    %cst_35 = arith.constant 1.000000e+00 : f32
    %130 = vector.broadcast %cst_35 : f32 to vector<8x1xf32>
    %131 = arith.addf %130, %129 : vector<8x1xf32>
    %132 = arith.divf %130, %131 : vector<8x1xf32>
    %cst_36 = arith.constant 1.000000e+00 : f32
    %133 = vector.broadcast %cst_36 : f32 to vector<8x1xf32>
    %134 = arith.cmpf olt, %104, %133 : vector<8x1xf32>
    %135 = arith.extui %134 : vector<8x1xi1> to vector<8x1xi32>
    %136 = arith.sitofp %135 : vector<8x1xi32> to vector<8x1xf32>
    %137 = arith.mulf %132, %136 : vector<8x1xf32>
    %138 = arith.addf %104, %137 : vector<8x1xf32>
    %cst_37 = arith.constant 0.899999976 : f32
    %139 = vector.broadcast %cst_37 : f32 to vector<8x1xf32>
    %140 = arith.cmpf ogt, %138, %139 : vector<8x1xf32>
    %141 = arith.extui %140 : vector<8x1xi1> to vector<8x1xi32>
    %142 = arith.sitofp %141 : vector<8x1xi32> to vector<8x1xf32>
    %143 = arith.mulf %142, %136 : vector<8x1xf32>
    %cst_38 = arith.constant 0.899999976 : f32
    %144 = vector.broadcast %cst_38 : f32 to vector<8x1xf32>
    %145 = arith.cmpf ole, %138, %144 : vector<8x1xf32>
    %146 = arith.extui %145 : vector<8x1xi1> to vector<8x1xi32>
    %147 = arith.sitofp %146 : vector<8x1xi32> to vector<8x1xf32>
    %148 = arith.mulf %147, %136 : vector<8x1xf32>
    %149 = arith.mulf %132, %148 : vector<8x1xf32>
    %150 = arith.addf %104, %149 : vector<8x1xf32>
    %cst_39 = arith.constant 1.000000e+00 : f32
    %151 = vector.broadcast %cst_39 : f32 to vector<8x1xf32>
    %152 = arith.subf %151, %150 : vector<8x1xf32>
    %153 = arith.mulf %143, %152 : vector<8x1xf32>
    %154 = arith.addf %102, %153 : vector<8x1xf32>
    %155 = arith.mulf %143, %154 : vector<8x1xf32>
    %156 = arith.addf %150, %155 : vector<8x1xf32>
    %157 = arith.addf %106, %148 : vector<8x1xf32>
    %158 = arith.addf %157, %143 : vector<8x1xf32>
    %159 = arith.mulf %132, %148 : vector<8x1xf32>
    %160 = arith.mulf %143, %154 : vector<8x1xf32>
    %161 = arith.addf %159, %160 : vector<8x1xf32>
    %162 = arith.truncf %122 : vector<8x32xf32> to vector<8x32xbf16>
    %cst_40 = arith.constant dense<0.000000e+00> : vector<8x32xf32>
    %163 = tpu.matmul %162, %3, %cst_40 {dimension_numbers = #tpu.dot_dimension_numbers<[1], [0], [0], [1], [0, 0, 1, 1], [], []>} : vector<8x32xbf16>, vector<32x32xbf16>, vector<8x32xf32> -> vector<8x32xf32>
    %164 = arith.addf %163, %10 : vector<8x32xf32>
    %cst_41 = arith.constant 0.000000e+00 : f32
    %165 = vector.broadcast %cst_41 : f32 to vector<8x32xf32>
    %166 = arith.maximumf %164, %165 : vector<8x32xf32>
    %167 = arith.subf %166, %118 : vector<8x32xf32>
    %168 = vector.broadcast %161 : vector<8x1xf32> to vector<8x32xf32>
    %169 = arith.mulf %168, %167 : vector<8x32xf32>
    %170 = arith.addf %118, %169 : vector<8x32xf32>
    %c3 = arith.constant 3 : index
    %c0_42 = arith.constant 0 : index
    %171 = vector.load %arg4[%c3, %c0_42] : memref<4x32xf32, #tpu.memory_space<vmem>>, vector<1x32xf32>
    %172 = arith.addf %166, %2 : vector<8x32xf32>
    %173 = vector.broadcast %171 : vector<1x32xf32> to vector<8x32xf32>
    %174 = arith.addf %172, %173 : vector<8x32xf32>
    %175 = arith.mulf %174, %7 : vector<8x32xf32>
    %cst_43 = arith.constant dense<0.000000e+00> : vector<8xf32>
    %176 = vector.multi_reduction <add>, %175, %cst_43 [1] : vector<8x32xf32> to vector<8xf32>
    %177 = vector.shape_cast %176 : vector<8xf32> to vector<8x1xf32>
    %178 = vector.broadcast %4 : f32 to vector<8x1xf32>
    %179 = arith.addf %177, %178 : vector<8x1xf32>
    %180 = arith.negf %179 : vector<8x1xf32>
    %181 = math.exp %180 : vector<8x1xf32>
    %cst_44 = arith.constant 1.000000e+00 : f32
    %182 = vector.broadcast %cst_44 : f32 to vector<8x1xf32>
    %183 = arith.addf %182, %181 : vector<8x1xf32>
    %184 = arith.divf %182, %183 : vector<8x1xf32>
    %cst_45 = arith.constant 1.000000e+00 : f32
    %185 = vector.broadcast %cst_45 : f32 to vector<8x1xf32>
    %186 = arith.cmpf olt, %156, %185 : vector<8x1xf32>
    %187 = arith.extui %186 : vector<8x1xi1> to vector<8x1xi32>
    %188 = arith.sitofp %187 : vector<8x1xi32> to vector<8x1xf32>
    %189 = arith.mulf %184, %188 : vector<8x1xf32>
    %190 = arith.addf %156, %189 : vector<8x1xf32>
    %cst_46 = arith.constant 0.899999976 : f32
    %191 = vector.broadcast %cst_46 : f32 to vector<8x1xf32>
    %192 = arith.cmpf ogt, %190, %191 : vector<8x1xf32>
    %193 = arith.extui %192 : vector<8x1xi1> to vector<8x1xi32>
    %194 = arith.sitofp %193 : vector<8x1xi32> to vector<8x1xf32>
    %195 = arith.mulf %194, %188 : vector<8x1xf32>
    %cst_47 = arith.constant 0.899999976 : f32
    %196 = vector.broadcast %cst_47 : f32 to vector<8x1xf32>
    %197 = arith.cmpf ole, %190, %196 : vector<8x1xf32>
    %198 = arith.extui %197 : vector<8x1xi1> to vector<8x1xi32>
    %199 = arith.sitofp %198 : vector<8x1xi32> to vector<8x1xf32>
    %200 = arith.mulf %199, %188 : vector<8x1xf32>
    %201 = arith.mulf %184, %200 : vector<8x1xf32>
    %202 = arith.addf %156, %201 : vector<8x1xf32>
    %cst_48 = arith.constant 1.000000e+00 : f32
    %203 = vector.broadcast %cst_48 : f32 to vector<8x1xf32>
    %204 = arith.subf %203, %202 : vector<8x1xf32>
    %205 = arith.mulf %195, %204 : vector<8x1xf32>
    %206 = arith.addf %154, %205 : vector<8x1xf32>
    %207 = arith.addf %158, %200 : vector<8x1xf32>
    %208 = arith.addf %207, %195 : vector<8x1xf32>
    %209 = arith.mulf %184, %200 : vector<8x1xf32>
    %210 = arith.mulf %195, %206 : vector<8x1xf32>
    %211 = arith.addf %209, %210 : vector<8x1xf32>
    %212 = arith.truncf %174 : vector<8x32xf32> to vector<8x32xbf16>
    %cst_49 = arith.constant dense<0.000000e+00> : vector<8x32xf32>
    %213 = tpu.matmul %212, %3, %cst_49 {dimension_numbers = #tpu.dot_dimension_numbers<[1], [0], [0], [1], [0, 0, 1, 1], [], []>} : vector<8x32xbf16>, vector<32x32xbf16>, vector<8x32xf32> -> vector<8x32xf32>
    %214 = arith.addf %213, %10 : vector<8x32xf32>
    %cst_50 = arith.constant 0.000000e+00 : f32
    %215 = vector.broadcast %cst_50 : f32 to vector<8x32xf32>
    %216 = arith.maximumf %214, %215 : vector<8x32xf32>
    %217 = arith.subf %216, %170 : vector<8x32xf32>
    %218 = vector.broadcast %211 : vector<8x1xf32> to vector<8x32xf32>
    %219 = arith.mulf %218, %217 : vector<8x32xf32>
    %220 = arith.addf %170, %219 : vector<8x32xf32>
    %c0_51 = arith.constant 0 : index
    %c0_52 = arith.constant 0 : index
    %c0_53 = arith.constant 0 : index
    %221 = vector.load %arg9[%c0_51, %c0_52, %c0_53] : memref<1x8x32xf32, #tpu.memory_space<vmem>>, vector<1x8x32xf32>
    %222 = vector.shape_cast %221 : vector<1x8x32xf32> to vector<8x32xf32>
    %223 = vector.shape_cast %220 : vector<8x32xf32> to vector<1x8x32xf32>
    tpu.vector_store %arg9[%c0_51, %c0_52, %c0_53], %223 {strides = array<i32>} : memref<1x8x32xf32, #tpu.memory_space<vmem>>, vector<1x8x32xf32>,
    %224 = tpu.transpose %206, [1, 0] : vector<8x1xf32> -> vector<1x8xf32>
    %c0_54 = arith.constant 0 : index
    %c0_55 = arith.constant 0 : index
    %c0_56 = arith.constant 0 : index
    %225 = vector.load %arg10[%c0_54, %c0_55, %c0_56] : memref<1x2x8xf32, #tpu.memory_space<vmem>>, vector<1x1x8xf32>
    %226 = vector.shape_cast %225 : vector<1x1x8xf32> to vector<1x8xf32>
    %227 = vector.shape_cast %224 : vector<1x8xf32> to vector<1x1x8xf32>
    tpu.vector_store %arg10[%c0_54, %c0_55, %c0_56], %227 {strides = array<i32>} : memref<1x2x8xf32, #tpu.memory_space<vmem>>, vector<1x1x8xf32>,
    %228 = tpu.transpose %208, [1, 0] : vector<8x1xf32> -> vector<1x8xf32>
    %c0_57 = arith.constant 0 : index
    %c1_58 = arith.constant 1 : index
    %c0_59 = arith.constant 0 : index
    %229 = vector.load %arg10[%c0_57, %c1_58, %c0_59] : memref<1x2x8xf32, #tpu.memory_space<vmem>>, vector<1x1x8xf32>
    %230 = vector.shape_cast %229 : vector<1x1x8xf32> to vector<1x8xf32>
    %231 = vector.shape_cast %228 : vector<1x8xf32> to vector<1x1x8xf32>
    tpu.vector_store %arg10[%c0_57, %c1_58, %c0_59], %231 {strides = array<i32>} : memref<1x2x8xf32, #tpu.memory_space<vmem>>, vector<1x1x8xf32>,
    return
  }
  func.func @transform_0(%arg0: i32, %arg1: i32) -> (i32, i32, i32) {
    %c0_i32 = arith.constant 0 : i32
    %c0_i32_0 = arith.constant 0 : i32
    return %arg0, %arg1, %c0_i32 : i32, i32, i32
  }
  func.func @transform_1(%arg0: i32, %arg1: i32) -> (i32, i32) {
    %c0_i32 = arith.constant 0 : i32
    %c0_i32_0 = arith.constant 0 : i32
    return %arg1, %c0_i32 : i32, i32
  }
  func.func @transform_2(%arg0: i32, %arg1: i32) -> (i32, i32) {
    %c0_i32 = arith.constant 0 : i32
    %c0_i32_0 = arith.constant 0 : i32
    %c0_i32_1 = arith.constant 0 : i32
    return %c0_i32, %c0_i32_0 : i32, i32
  }
  func.func @transform_3(%arg0: i32, %arg1: i32) -> (i32, i32) {
    %c0_i32 = arith.constant 0 : i32
    %c0_i32_0 = arith.constant 0 : i32
    %c0_i32_1 = arith.constant 0 : i32
    return %c0_i32, %c0_i32_0 : i32, i32
  }
  func.func @transform_4(%arg0: i32, %arg1: i32) -> (i32, i32) {
    %c0_i32 = arith.constant 0 : i32
    %c0_i32_0 = arith.constant 0 : i32
    %c0_i32_1 = arith.constant 0 : i32
    return %c0_i32, %c0_i32_0 : i32, i32
  }
  func.func @transform_5(%arg0: i32, %arg1: i32) -> (i32, i32) {
    %c0_i32 = arith.constant 0 : i32
    %c0_i32_0 = arith.constant 0 : i32
    %c0_i32_1 = arith.constant 0 : i32
    return %c0_i32, %c0_i32_0 : i32, i32
  }
  func.func @transform_6(%arg0: i32, %arg1: i32) -> i32 {
    %c0_i32 = arith.constant 0 : i32
    %c0_i32_0 = arith.constant 0 : i32
    return %c0_i32 : i32
  }
  func.func @transform_7(%arg0: i32, %arg1: i32) -> (i32, i32, i32) {
    %c0_i32 = arith.constant 0 : i32
    %c0_i32_0 = arith.constant 0 : i32
    return %arg0, %arg1, %c0_i32 : i32, i32, i32
  }
  func.func @transform_8(%arg0: i32, %arg1: i32) -> (i32, i32, i32) {
    %c0_i32 = arith.constant 0 : i32
    %c0_i32_0 = arith.constant 0 : i32
    return %arg0, %c0_i32, %arg1 : i32, i32, i32
  }
}

</mosaic_0001>

<bundles_post_ra>
// kernel: tpu_custom_call.1
= control target key start
LH: loop header
LB: loop body
LE: loop exit
PB: predicated region body
PF: predicated region fallthrough
CT: control target
= control target key end

     0   :  { %s1841_s0 = inlined_call_operand.hbm [shape: f32[2,8,32], index: 0, kind: input, shape index: {}]   ;;  %s1842_s1 = inlined_call_operand.hbm [shape: f32[8,32], index: 1, kind: input, shape index: {}]   ;;  %s1843_s2 = inlined_call_operand.hbm [shape: f32[4,32], index: 2, kind: input, shape index: {}]   ;;  %s1844_s3 = inlined_call_operand.vmem [shape: f32[1,32], index: 3, kind: input, shape index: {}]   ;;  %s1845_s4 = inlined_call_operand.vmem [shape: bf16[32,32], index: 4, kind: input, shape index: {}]   ;;  %s1846_s5 = inlined_call_operand.vmem [shape: f32[1,32], index: 5, kind: input, shape index: {}]   ;;  %s1847_s6 = inlined_call_operand.<no memory space> [shape: f32[1], index: 6, kind: input, shape index: {}]   ;;  %s1848_s7 = inlined_call_operand.hbm [shape: f32[2,8,32], index: 7, kind: output, shape index: {0}]   ;;  %s1849_s8 = inlined_call_operand.hbm [shape: f32[2,2,8], index: 8, kind: output, shape index: {1}]  }
   0x1   :  { %1854 = sst [smem:[#allocation16_spill]] %s1842_s1 }
   0x2   :  { %14 = sst [smem:[#allocation2]] %s1847_s6 }
   0x3   :  { %15 = vsyncpa [#allocation4], 0 }
   0x4   :  { %17 = vsyncpa [#allocation4 + $0x1], 0 }
   0x5   :  { %18 = vsyncpa [#allocation7], 0 }
   0x6   :  { %19 = vsyncpa [#allocation5], 0 }
   0x7   :  { %21 = vsyncpa [#allocation5 + $0x1], 0 }
   0x8   :  { %22 = vsyncpa [#allocation11], 0 }
   0x9   :  { %24 = vsyncpa [#allocation11 + $0x1], 0  ;;  %s1470_s29 = smov 0   ;;  %s1472_s30 = smov 0  }
   0xa   :  { %s1474_s9 = smov 0   ;;  %s1476_s10 = smov 0  }
   0xb   :  { %s1478_s11 = smov 0   ;;  %s1480_s12 = smov 0  }
   0xc LB: > { %s1010_s6 = sadd.s32 4294967295, %s1413_s12   ;;  %s1011_s13 = sadd.s32 4294967294, %s1413_s12   ;;  %s1413_s12 = sphi %s1480_s12, %s30_s12   ;;  %s1409_s11 = sphi %s1478_s11, %s1874_s11   ;;  %s1405_s10 = sphi %s1476_s10, %s1873_s10   ;;  %s1401_s9 = sphi %s1474_s9, %s1872_s9   ;;  %s1397_s30 = sphi %s1472_s30, %s1871_s30   ;;  %s1393_s29 = sphi %s1470_s29, %s1870_s29  }
   0xd   : > { %p64_p0 = scmp.ne.s32.totalorder %s1397_s30, %s1393_s29  ;;  %p1504_p1 = scmp.eq.s32.totalorder %s1010_s6, 0 }
   0xe   : > { %p1508_p2 = scmp.eq.s32.totalorder %s1010_s6, 1  ;;  %p227_p3 = scmp.eq.s32.totalorder %s1011_s13, 1 }
   0xf   : > { %s1855_s14 = scalar_select %p1504_p1, 1, 0 }
  0x10   : > { %s1856_s15 = scalar_select %p1508_p2, 1, 0 }
  0x11   : > { %p1514_p4 = por %p1504_p1, %p64_p0  ;;  %p1012_p5 = scmp.ge.s32.totalorder %s1413_s12, 1 }
  0x12   : > { %p1519_p6 = por %p227_p3, %p64_p0  ;;  %p262_p7 = scmp.lt.s32.totalorder %s1413_s12, 3 }
  0x13   : > { %s1857_s16 = scalar_select %p1514_p4, 1, 0 }
  0x14   : > { %s1858_s17 = scalar_select %p1519_p6, 1, 0 }
  0x15   : > { %p1524_p8 = pnand %p1012_p5, %p262_p7  ;;  %s1415_s19 = smov [#allocation6]  }
  0x16   : > { %s277_s20 = sshll.u32 %s1415_s19, 4  ;;  %s1416_s21 = smov [#allocation8]   ;;  %s278_s20 = int_to_ptr.vmem [resolvable:$true] %s277_s20 }
  0x17   : > { %s1859_s18 = scalar_select %p1524_p8, 1, 0 }
  0x18   : > { %p1115_p10 = pneg %p1524_p8  ;;  %s288_s22 = sshll.u32 %s1416_s21, 4  ;;  %s1537_s22 = int_to_ptr.vmem [resolvable:$true] %s288_s22 }
  0x19   : > { %s1861_s1 = sld [smem:[#allocation16_spill]] }
  0x1a   : > { %p1533_p11 = pnand %p1115_p10, %p1504_p1 }
  0x1c   : > { %p1211_p13 = pneg %p1533_p11 }
  0x1f   : > { %s1209_s26 = scalar_lea.hbm %s1861_s1, 128 }
  0x20   : > { %p1210_p12 = scmp.ne.s32.totalorder %s1861_s1, %s1209_s26  ;;  %p1216_p5 = scmp.lt.u32.totalorder %s1209_s26, %s1861_s1 }
  0x22   : > { %p1212_p0 = pnand %p1211_p13, %p1210_p12 }
  0x24   : > { %p1213_p3 = pneg %p1212_p0 }
  0x26   : > { %p1218_p7 = pnand %p1216_p5, %p1213_p3 }
  0x28   : > { %1221 = shalt.err (!%p1218_p7)
}
  0x29   : > { %s1222_s19 = scalar_lea.vmem %s278_s20, 128  ;;  %p1230_p1 = scmp.lt.s32.totalorder %s278_s20, %s278_s20 }
  0x2a   : > { %p1223_p10 = scmp.ne.s32.totalorder %s278_s20, %s1222_s19  ;;  %p1231_p4 = scmp.lt.s32.totalorder %s1222_s19, %s1222_s19 }
  0x2c   : > { %p1225_p9 = pnand %p1223_p10, %p1211_p13  ;;  %p1232_p8 = por %p1231_p4, %p1230_p1 }
  0x2e   : > { %p1226_p6 = pneg %p1225_p9 }
  0x30   : > { %p1233_p2 = pnand %p1232_p8, %p1226_p6 }
  0x32   : > { %1236 = shalt.err (!%p1233_p2)
}
  0x33   : > { %1118 = dma.hbm_to_vmem [thread:$0]  (!%p1533_p11), %s1861_s1, 128, %s278_s20, [#allocation7]  }
  0x34   : > { %s1237_s27 = scalar_lea.hbm %s1843_s2, 64 }
  0x35   : > { %p1238_p9 = scmp.ne.s32.totalorder %s1843_s2, %s1237_s27  ;;  %p1244_p2 = scmp.lt.u32.totalorder %s1237_s27, %s1843_s2 }
  0x37   : > { %p1240_p1 = pnand %p1238_p9, %p1211_p13 }
  0x39   : > { %p1241_p4 = pneg %p1240_p1 }
  0x3b   : > { %p1246_p6 = pnand %p1244_p2, %p1241_p4 }
  0x3d   : > { %1249 = shalt.err (!%p1246_p6)
}
  0x3e   : > { %s1250_s20 = scalar_lea.vmem %s1537_s22, 64  ;;  %p1258_p3 = scmp.lt.s32.totalorder %s1537_s22, %s1537_s22 }
  0x3f   : > { %p1251_p8 = scmp.ne.s32.totalorder %s1537_s22, %s1250_s20  ;;  %p1259_p5 = scmp.lt.s32.totalorder %s1250_s20, %s1250_s20 }
  0x41   : > { %p1253_p12 = pnand %p1251_p8, %p1211_p13  ;;  %p1260_p7 = por %p1259_p5, %p1258_p3 }
  0x43   : > { %p1254_p0 = pneg %p1253_p12 }
  0x45   : > { %p1261_p10 = pnand %p1260_p7, %p1254_p0 }
  0x47   : > { %1264 = shalt.err (!%p1261_p10)
}
  0x48   : > { %1121 = dma.hbm_to_vmem [thread:$0]  (!%p1533_p11), %s1843_s2, 64, %s1537_s22, [#allocation7]  }
  0x49   : > { %s42_s25 = sadd.s32 1, %s1409_s11  ;;  %s51_s26 = sadd.s32 1, %s1401_s9 }
  0x4a   : > { %p44_p13 = scmp.ge.s32.totalorder %s42_s25, 2  ;;  %p58_p9 = scmp.ne.s32.totalorder %s1401_s9, %s1397_s30 }
  0x4b   : > { %p59_p1 = scmp.eq.s32.totalorder %s1413_s12, 0  ;;  %p1135_p4 = scmp.lt.s32.totalorder %s1413_s12, 2 }
  0x4c   : > { %s1876_s25 = smov (%p44_p13, %s42_s25), 0  ;;  %p1862_p6 = scmp.ne.s32.totalorder %s1856_s15, 0 }
  0x4d   : > { %p60_p2 = por %p59_p1, %p58_p9  ;;  %s46_s27 = ssub.s32 %s1409_s11, %s1876_s25 }
  0x4e   : > { %p1596_p8 = por %p1862_p6, %p58_p9  ;;  %s311_s28 = sand.u32 1, %s1401_s9  }
  0x4f   : > { %p49_p12 = scmp.eq.s32.totalorder %s46_s27, 0  ;;  %s1016_s22 = sshll.u32 %s311_s28, 3 }
  0x50   : > { %s1017_s6 = sshll.u32 %s1409_s11, 7  ;;  %s315_s15 = scalar_lea.vmem [#allocation3], %s1016_s22 }
  0x51   : > { %s1605_s13 = scalar_select %p49_p12, %s1401_s9, %s51_s26  }
  0x52   : > { %s1610_s21 = scalar_lea.hbm %s1841_s0, %s1017_s6  ;;  %s323_s24 = sshll.u32 %s315_s15, 4  ;;  %s1618_s24 = int_to_ptr.vmem [resolvable:$true] %s323_s24 }
  0x53   : > { %p1614_p11 = pnand %p1135_p4, %p60_p2  ;;  %s312_s26 = scalar_lea.sflag [#allocation4], %s311_s28 }
  0x54   : > { %s1265_s27 = scalar_lea.hbm %s1610_s21, 128  ;;  %s1270_s19 = scalar_lea.hbm %s1841_s0, 256 }
  0x55   : > { %p1266_p0 = scmp.ne.s32.totalorder %s1610_s21, %s1265_s27  ;;  %p1267_p3 = pneg %p1614_p11 }
  0x56   : > { %p1271_p10 = scmp.lt.u32.totalorder %s1610_s21, %s1841_s0  ;;  %p1272_p13 = scmp.lt.u32.totalorder %s1270_s19, %s1265_s27 }
  0x57   : > { %p1268_p5 = pnand %p1267_p3, %p1266_p0  ;;  %p1274_p1 = scmp.lt.u32.totalorder %s1265_s27, %s1610_s21 }
  0x58   : > { %p1273_p9 = por %p1272_p13, %p1271_p10 }
  0x59   : > { %p1269_p7 = pneg %p1268_p5 }
  0x5a   : > { %p1275_p4 = por %p1274_p1, %p1273_p9 }
  0x5c   : > { %p1276_p2 = pnand %p1275_p4, %p1269_p7 }
  0x5e   : > { %1279 = shalt.err (!%p1276_p2)
}
  0x5f   : > { %s1280_s28 = scalar_lea.vmem %s1618_s24, 128  ;;  %s1417_s22 = smov [#allocation3]  }
  0x60   : > { %p1281_p6 = scmp.ne.s32.totalorder %s1618_s24, %s1280_s28  ;;  %s1285_s6 = sshll.u32 %s1417_s22, 4  ;;  %s1286_s6 = int_to_ptr.vmem [resolvable:$false] %s1285_s6 }
  0x61   : > { %s1287_s20 = scalar_lea.vmem %s1286_s6, 256  ;;  %p1288_p5 = scmp.lt.s32.totalorder %s1618_s24, %s1286_s6 }
  0x62   : > { %p1283_p12 = pnand %p1281_p6, %p1267_p3  ;;  %p1289_p10 = scmp.lt.s32.totalorder %s1287_s20, %s1280_s28 }
  0x64   : > { %p1284_p0 = pneg %p1283_p12  ;;  %p1290_p13 = por %p1289_p10, %p1288_p5 }
  0x66   : > { %p1291_p9 = pnand %p1290_p13, %p1284_p0 }
  0x68   : > { %1294 = shalt.err (!%p1291_p9)
}
  0x69   : > { %1125 = dma.hbm_to_vmem [thread:$0]  (!%p1614_p11), %s1610_s21, 128, %s1618_s24, %s312_s26  }
  0x6a   : > { %p1865_p7 = scmp.ne.s32.totalorder %s1859_s18, 0 }
  0x6b   : > { %s1648_s27 = sand.u32 (!%p1865_p7), 1, %s1397_s30   ;;  %p1866_p3 = scmp.ne.s32.totalorder (!%p1865_p7), %s1857_s16, 0 }
  0x6c   : > { %332 = sbr.rel (%p1865_p7) target bundleno = 1127 (0x467), region = 48  ;;  %s1019_s19 = sshll.u32 (!%p1865_p7), %s1648_s27, 3 }
  0x6d   : > { %s335_s15 = scalar_lea.sflag (!%p1865_p7), [#allocation4], %s1648_s27  ;;  %s338_s28 = scalar_lea.vmem (!%p1865_p7), [#allocation3], %s1019_s19 }
  0x73   : > { %1376 = dma.done.wait (%p1866_p3), %s335_s15, 128  }
  0x74   : > { %1378 = vsyncadd (%p1866_p3), %s335_s15, 4294967168  ;;  %p1867_p11 = scmp.ne.s32.totalorder %s1855_s14, 0 }
  0x76   : > { %1380 = dma.done.wait (%p1867_p11), [#allocation7], 192  }
  0x77   : > { %1382 = vsyncadd (%p1867_p11), [#allocation7], 4294967104  ;;  %v1418_v0 = vmov 0.0   ;;  %vm1419_vm0 = vmmov 0   ;;  %v1191_v1 = vld [vmem:[%s1845_s4] sm:$0xff]   ;;  %v1192_v2 = vld [vmem:[%s1845_s4 + $0x8] sm:$0xff]  }
  0x78   : > { %1069 = vmatprep.subr.bf16.mxu0 %v1418_v0  ;;  %1073 = vmatprep.mubr.msk.bf16.mxu0 %vm1419_vm0, %v1418_v0  ;;  %v385_v3 = vld [vmem:[%s338_s28] sm:$0xff]  ;;  %v1674_v4 = vld [vmem:[#allocation6] sm:$0xff]  ;;  %v1026_v5 = vld [vmem:[#allocation8] ss:$0 sm:$0xff]  ;;  %vm414_vm1 = vcmask 261120   ;;  %s391_s6 = sld [smem:[#allocation2]] }
  0x79   : > { %1077 = vmatprep.subr.bf16.mxu1 %v1418_v0  ;;  %1081 = vmatprep.mubr.msk.bf16.mxu1 %vm1419_vm0, %v1418_v0  ;;  %v407_v6 = vadd.f32 %v1674_v4, %v385_v3  ;;  %v1682_v7 = vld [vmem:[%s1844_s3] ss:$0 sm:$0xff]  ;;  %v1033_v19 = vld [vmem:[#allocation8 + $0x1] ss:$0 sm:$0xff]  ;;  %s1053_s20 = sshll.u32 %s1405_s10, 7  ;;  %s376_s15 = scalar_lea.vmem [#allocation9], %s1019_s19 }
  0x7a   : > { %1070 = vmatpush3.bf16.msra.mxu0 %v1191_v1  ;;  %1078 = vmatpush3.bf16.msra.mxu1 %v1191_v1  ;;  %v1695_v12 = vld [vmem:[%s1846_s5] ss:$0 sm:$0xff]  ;;  %s862_s28 = sshll.u32 %s376_s15, 4  ;;  %s1760_s18 = scalar_lea.hbm %s1848_s7, %s1053_s20  ;;  %s1762_s28 = int_to_ptr.vmem [resolvable:$true] %s862_s28 }
  0x7b   : > { %1071 = vmatprep.subr.bf16.mxu0 %v1418_v0  ;;  %1079 = vmatprep.subr.bf16.mxu1 %v1418_v0  ;;  %v412_v8 = vadd.f32 %v1026_v5, %v407_v6  ;;  %s843_s21 = scalar_lea.sflag [#allocation5], %s1648_s27  ;;  %s1295_s14 = scalar_lea.vmem %s1762_s28, 128 }
  0x7c   : > { %p1296_p1 = scmp.ne.s32.totalorder %s1762_s28, %s1295_s14  ;;  %s1420_s19 = smov [#allocation9]  }
  0x7d   : > { %v449_v9 = vpack.c.bf16 %v412_v8, %v412_v8  ;;  %v413_v10 = vmul.f32 %v1682_v7, %v412_v8  ;;  %s1299_s24 = sshll.u32 %s1420_s19, 4  ;;  %s1300_s24 = int_to_ptr.vmem [resolvable:$false] %s1299_s24 }
  0x7e   : > { %1072 = vmatpush3.bf16.msra.mxu0 %v1192_v2  ;;  %1080 = vmatpush3.bf16.msra.mxu1 %v1192_v2  ;;  %v1708_v25 = vstv %s391_s6  ;;  %p1297_p4 = pnand %p1296_p1, %p1596_p8  ;;  %s1301_s26 = scalar_lea.vmem %s1300_s24, 256 }
  0x7f   : > { %1085 = vmatprep.subr.bf16.mxu0 %v1418_v0  ;;  %1093 = vmatprep.subr.bf16.mxu1 %v1418_v0  ;;  %v415_v11 = vsel %vm414_vm1, %v413_v10, 0.0  ;;  %p1302_p6 = scmp.lt.s32.totalorder %s1762_s28, %s1300_s24  ;;  %p1303_p12 = scmp.lt.s32.totalorder %s1301_s26, %s1295_s14 }
  0x80   : > { %416 = vadd.xlane.f32.xlu0 %v415_v11  ;;  %p1298_p2 = pneg %p1297_p4 }
  0x81   : > { %1074 = vmatmul.mubr.msk.bf16.vlgmr.msra.gmra.mrb[0].mxu0 %vm414_vm1, %v449_v9  ;;  %p1304_p0 = por %p1303_p12, %p1302_p6 }
  0x82   : > { %1086 = vmatpush3.bf16.msra.mxu0 %v1191_v1  ;;  %1089 = vmatprep.mubr.msk.bf16.mxu0 %vm1419_vm0, %v1418_v0 }
  0x83   : > { %1087 = vmatprep.subr.bf16.mxu0 %v1418_v0  ;;  %p1305_p5 = pnand %p1304_p0, %p1298_p2 }
  0x86   : > { %1088 = vmatpush3.bf16.msra.mxu0 %v1192_v2 }
 0x10d   : > { %v417_v26 = vpop.xlane.xlu0 %416 }
 0x10e   : > { %v419_v27 = vadd.f32 %v1708_v25, %v417_v26 }
 0x110   : > { %v1027_v28 = vmul.f32 -1.442695, %v419_v27 }
 0x112   : > { %1193 = vpow2.f32 %v1027_v28 }
 0x11c   : > { %v1194_v29 = vpop.eup %1193 }
 0x11d   : > { %v423_v30 = vadd.f32 1.0, %v1194_v29 }
 0x11f   : > { %1195 = vrcp.f32 %v423_v30 }
 0x129   : > { %v1196_v31 = vpop.eup %1195 }
 0x12a   : > { %vm435_vm2 = vcmp.le.f32.partialorder %v1196_v31, 0.9  ;;  %vm431_vm3 = vcmp.gt.f32.partialorder %v1196_v31, 0.9 }
 0x12b   : > { %v1713_v35 = vsel %vm435_vm2, 1.0, %v1418_v0  ;;  %v1717_v38 = vsel %vm431_vm3, 1.0, %v1418_v0 }
 0x12c   : > { %v439_v36 = vmul.f32 %v1196_v31, %v1713_v35 }
 0x12e   : > { %v441_v37 = vsub.f32 1.0, %v439_v36 }
 0x130   : > { %v442_v40 = vmul.f32 %v1717_v38, %v441_v37 }
 0x132   : > { %v444_v42 = vmul.f32 %v1717_v38, %v442_v40 }
 0x134   : > { %v445_v43 = vadd.f32 %v444_v42, %v439_v36 }
 0x136   : > { %vm526_vm4 = vcmp.lt.f32.partialorder %v445_v43, 1.0 }
 0x137   : > { %v1035_v45 = vsel %vm526_vm4, 1.0, %v1418_v0 }
 0x154   : > { %v499_v13 = vpop.f32.mrb[0].mxu0 }
 0x155   : > { %v1698_v14 = vadd.f32 %v1695_v12, %v499_v13  ;;  %v1075_v15 = vpop.f32.mrb[1].mxu0 }
 0x156   : > { %v502_v16 = vpop.f32.mrb[2].mxu0 }
 0x157   : > { %v505_v17 = vmax.f32 %v1698_v14, 0.0  ;;  %v1076_v18 = vpop.f32.mrb[3].mxu0 }
 0x159   : > { %v509_v20 = vadd.f32 %v505_v17, %v1674_v4  ;;  %v506_v62 = vmul.f32 %v505_v17, %v445_v43 }
 0x15b   : > { %v514_v21 = vadd.f32 %v1033_v19, %v509_v20 }
 0x15d   : > { %v549_v22 = vpack.c.bf16 %v514_v21, %v514_v21  ;;  %v515_v23 = vmul.f32 %v1682_v7, %v514_v21 }
 0x15f   : > { %1082 = vmatmul.mubr.msk.bf16.vlgmr.msra.gmra.mrb[0].mxu1 %vm414_vm1, %v549_v22  ;;  %v516_v24 = vsel %vm414_vm1, %v515_v23, 0.0 }
 0x160   : > { %517 = vadd.xlane.f32.xlu0 %v516_v24  ;;  %1094 = vmatpush3.bf16.msra.mxu1 %v1191_v1 }
 0x161   : > { %1095 = vmatprep.subr.bf16.mxu1 %v1418_v0  ;;  %1097 = vmatprep.mubr.msk.bf16.mxu1 %vm1419_vm0, %v1418_v0 }
 0x164   : > { %1096 = vmatpush3.bf16.msra.mxu1 %v1192_v2  ;;  %v1039_v2 = vld [vmem:[#allocation8 + $0x2] ss:$0 sm:$0xff] }
 0x1ed   : > { %v518_v32 = vpop.xlane.xlu0 %517 }
 0x1ee   : > { %v519_v33 = vadd.f32 %v518_v32, %v1708_v25 }
 0x1f0   : > { %v1034_v34 = vmul.f32 -1.442695, %v519_v33 }
 0x1f2   : > { %1197 = vpow2.f32 %v1034_v34 }
 0x1fc   : > { %v1198_v39 = vpop.eup %1197 }
 0x1fd   : > { %v523_v41 = vadd.f32 1.0, %v1198_v39 }
 0x1ff   : > { %1199 = vrcp.f32 %v523_v41 }
 0x209   : > { %v1200_v44 = vpop.eup %1199 }
 0x20a   : > { %v529_v46 = vmul.f32 %v1200_v44, %v1035_v45 }
 0x20c   : > { %v530_v47 = vadd.f32 %v529_v46, %v445_v43 }
 0x20e   : > { %vm535_vm5 = vcmp.le.f32.partialorder %v530_v47, 0.9  ;;  %vm531_vm6 = vcmp.gt.f32.partialorder %v530_v47, 0.9 }
 0x20f   : > { %v1037_v48 = vsel %vm535_vm5, 1.0, %v1418_v0  ;;  %v1036_v52 = vsel %vm531_vm6, 1.0, %v1418_v0 }
 0x210   : > { %v1723_v49 = vmul.f32 %v1037_v48, %v1035_v45  ;;  %v1727_v54 = vmul.f32 %v1036_v52, %v1035_v45 }
 0x212   : > { %v539_v50 = vmul.f32 %v1200_v44, %v1723_v49  ;;  %v1045_v44 = vld [vmem:[#allocation8 + $0x3] ss:$0 sm:$0xff] }
 0x214   : > { %v540_v51 = vadd.f32 %v539_v50, %v445_v43 }
 0x216   : > { %v541_v53 = vsub.f32 1.0, %v540_v51 }
 0x218   : > { %v542_v55 = vmul.f32 %v541_v53, %v1727_v54 }
 0x21a   : > { %v543_v56 = vadd.f32 %v542_v55, %v442_v40 }
 0x21c   : > { %v544_v58 = vmul.f32 %v543_v56, %v1727_v54 }
 0x21e   : > { %v548_v3 = vadd.f32 %v544_v58, %v539_v50  ;;  %v545_v20 = vadd.f32 %v544_v58, %v540_v51 }
 0x220   : > { %vm615_vm7 = vcmp.lt.f32.partialorder %v545_v20, 1.0 }
 0x221   : > { %v1041_v22 = vsel %vm615_vm7, 1.0, %v1418_v0 }
 0x232   : > { %v587_v57 = vpop.f32.mrb[0].mxu1 }
 0x233   : > { %v588_v59 = vadd.f32 %v1695_v12, %v587_v57  ;;  %v1083_v60 = vpop.f32.mrb[1].mxu1 }
 0x234   : > { %v590_v61 = vpop.f32.mrb[2].mxu1 }
 0x235   : > { %v593_v63 = vmax.f32 %v588_v59, 0.0  ;;  %v1084_v1 = vpop.f32.mrb[3].mxu1  ;;  %v447_v61 = vadd.f32 %v1713_v35, %v1717_v38 }
 0x237   : > { %v594_v5 = vsub.f32 %v593_v63, %v506_v62  ;;  %v598_v6 = vadd.f32 %v593_v63, %v1674_v4 }
 0x239   : > { %v595_v8 = vmul.f32 %v594_v5, %v548_v3  ;;  %v603_v9 = vadd.f32 %v1039_v2, %v598_v6 }
 0x23b   : > { %v638_v10 = vpack.c.bf16 %v603_v9, %v603_v9  ;;  %v604_v11 = vmul.f32 %v1682_v7, %v603_v9  ;;  %v596_v13 = vadd.f32 %v595_v8, %v506_v62 }
 0x23d   : > { %1090 = vmatmul.mubr.msk.bf16.vlgmr.msra.gmra.mrb[4].mxu0 %vm414_vm1, %v638_v10  ;;  %v605_v14 = vsel %vm414_vm1, %v604_v11, 0.0 }
 0x23e   : > { %606 = vadd.xlane.f32.xlu1 %v605_v14 }
 0x2cb   : > { %v607_v15 = vpop.xlane.xlu1 %606 }
 0x2cc   : > { %v608_v16 = vadd.f32 %v607_v15, %v1708_v25 }
 0x2ce   : > { %v1040_v17 = vmul.f32 -1.442695, %v608_v16 }
 0x2d0   : > { %1201 = vpow2.f32 %v1040_v17 }
 0x2da   : > { %v1202_v18 = vpop.eup %1201 }
 0x2db   : > { %v612_v19 = vadd.f32 1.0, %v1202_v18 }
 0x2dd   : > { %1203 = vrcp.f32 %v612_v19 }
 0x2e7   : > { %v1204_v21 = vpop.eup %1203 }
 0x2e8   : > { %v618_v23 = vmul.f32 %v1204_v21, %v1041_v22 }
 0x2ea   : > { %v619_v24 = vadd.f32 %v618_v23, %v545_v20 }
 0x2ec   : > { %vm624_vm8 = vcmp.le.f32.partialorder %v619_v24, 0.9  ;;  %vm620_vm9 = vcmp.gt.f32.partialorder %v619_v24, 0.9 }
 0x2ed   : > { %v1043_v26 = vsel %vm624_vm8, 1.0, %v1418_v0  ;;  %v1042_v30 = vsel %vm620_vm9, 1.0, %v1418_v0 }
 0x2ee   : > { %v627_v27 = vmul.f32 %v1043_v26, %v1041_v22  ;;  %v623_v32 = vmul.f32 %v1042_v30, %v1041_v22 }
 0x2f0   : > { %v628_v28 = vmul.f32 %v1204_v21, %v627_v27 }
 0x2f2   : > { %v629_v29 = vadd.f32 %v628_v28, %v545_v20 }
 0x2f4   : > { %v630_v31 = vsub.f32 1.0, %v629_v29 }
 0x2f6   : > { %v631_v33 = vmul.f32 %v630_v31, %v623_v32 }
 0x2f8   : > { %v632_v34 = vadd.f32 %v631_v33, %v543_v56 }
 0x2fa   : > { %v633_v37 = vmul.f32 %v632_v34, %v623_v32 }
 0x2fc   : > { %v637_v45 = vadd.f32 %v633_v37, %v628_v28 }
 0x310   : > { %v676_v36 = vpop.f32.mrb[4].mxu0 }
 0x311   : > { %v677_v39 = vadd.f32 %v1695_v12, %v676_v36  ;;  %v1091_v40 = vpop.f32.mrb[5].mxu0 }
 0x312   : > { %v679_v41 = vpop.f32.mrb[6].mxu0 }
 0x313   : > { %v682_v42 = vmax.f32 %v677_v39, 0.0  ;;  %v1092_v43 = vpop.f32.mrb[7].mxu0 }
 0x315   : > { %v683_v46 = vsub.f32 %v682_v42, %v596_v13  ;;  %v687_v47 = vadd.f32 %v682_v42, %v1674_v4  ;;  %v634_v4 = vadd.f32 %v633_v37, %v629_v29 }
 0x317   : > { %v684_v48 = vmul.f32 %v683_v46, %v637_v45  ;;  %v692_v50 = vadd.f32 %v1045_v44, %v687_v47  ;;  %vm704_vm10 = vcmp.lt.f32.partialorder %v634_v4, 1.0 }
 0x318   : > { %v1047_v63 = vsel %vm704_vm10, 1.0, %v1418_v0 }
 0x319   : > { %v726_v51 = vpack.c.bf16 %v692_v50, %v692_v50  ;;  %v693_v52 = vmul.f32 %v1682_v7, %v692_v50  ;;  %v685_v53 = vadd.f32 %v684_v48, %v596_v13  ;;  %v546_v7 = vadd.f32 %v1723_v49, %v447_v61 }
 0x31b   : > { %1098 = vmatmul.mubr.msk.bf16.vlgmr.msra.gmra.mrb[4].mxu1 %vm414_vm1, %v726_v51  ;;  %v694_v55 = vsel %vm414_vm1, %v693_v52, 0.0  ;;  %v547_v1 = vadd.f32 %v546_v7, %v1727_v54 }
 0x31c   : > { %695 = vadd.xlane.f32.xlu1 %v694_v55 }
 0x31d   : > { %v635_v3 = vadd.f32 %v627_v27, %v547_v1 }
 0x31f   : > { %v636_v8 = vadd.f32 %v635_v3, %v623_v32 }
 0x3a9   : > { %v696_v56 = vpop.xlane.xlu1 %695 }
 0x3aa   : > { %v697_v57 = vadd.f32 %v696_v56, %v1708_v25 }
 0x3ac   : > { %v1046_v58 = vmul.f32 -1.442695, %v697_v57 }
 0x3ae   : > { %1205 = vpow2.f32 %v1046_v58 }
 0x3b8   : > { %v1206_v59 = vpop.eup %1205 }
 0x3b9   : > { %v701_v60 = vadd.f32 1.0, %v1206_v59 }
 0x3bb   : > { %1207 = vrcp.f32 %v701_v60 }
 0x3c5   : > { %v1208_v62 = vpop.eup %1207 }
 0x3c6   : > { %v707_v2 = vmul.f32 %v1208_v62, %v1047_v63 }
 0x3c8   : > { %v708_v25 = vadd.f32 %v707_v2, %v634_v4 }
 0x3ca   : > { %vm709_vm11 = vcmp.gt.f32.partialorder %v708_v25, 0.9  ;;  %vm713_vm12 = vcmp.le.f32.partialorder %v708_v25, 0.9 }
 0x3cb   : > { %v1048_v5 = vsel %vm709_vm11, 1.0, %v1418_v0  ;;  %v1049_v6 = vsel %vm713_vm12, 1.0, %v1418_v0 }
 0x3cc   : > { %v716_v9 = vmul.f32 %v1049_v6, %v1047_v63  ;;  %v712_v35 = vmul.f32 %v1048_v5, %v1047_v63 }
 0x3ce   : > { %v722_v38 = vadd.f32 %v716_v9, %v636_v8  ;;  %v717_v49 = vmul.f32 %v1208_v62, %v716_v9 }
 0x3d0   : > { %v723_v10 = vadd.f32 %v722_v38, %v712_v35  ;;  %v718_v11 = vadd.f32 %v717_v49, %v634_v4 }
 0x3d2   : > { %809 = vxpose.xlu1.b32.start.end [1/1] (short) (narrow) %v723_v10, 8  ;;  %v719_v54 = vsub.f32 1.0, %v718_v11 }
 0x3d4   : > { %v720_v13 = vmul.f32 %v719_v54, %v712_v35 }
 0x3d6   : > { %v721_v14 = vadd.f32 %v720_v13, %v632_v34 }
 0x3d8   : > { %775 = vxpose.xlu0.b32.start.end [1/1] (short) (narrow) %v721_v14, 8  ;;  %v724_v16 = vmul.f32 %v721_v14, %v712_v35 }
 0x3da   : > { %v725_v21 = vadd.f32 %v724_v16, %v717_v49 }
 0x3ee   : > { %v764_v15 = vpop.f32.mrb[4].mxu1 }
 0x3ef   : > { %v765_v17 = vadd.f32 %v1695_v12, %v764_v15  ;;  %v1099_v0 = vpop.f32.mrb[5].mxu1 }
 0x3f0   : > { %v767_v18 = vpop.f32.mrb[6].mxu1 }
 0x3f1   : > { %v770_v19 = vmax.f32 %v765_v17, 0.0  ;;  %v1100_v20 = vpop.f32.mrb[7].mxu1 }
 0x3f3   : > { %v771_v22 = vsub.f32 %v770_v19, %v685_v53 }
 0x3f5   : > { %v772_v23 = vmul.f32 %v771_v22, %v725_v21 }
 0x3f7   : > { %v773_v24 = vadd.f32 %v772_v23, %v685_v53 }
 0x3f9   : > { %774 = vst.msk [vmem:[%s376_s15] sm:$0xff] %vm414_vm1, %v773_v24 }
 0x3fa   : > { %1308 = shalt.err (!%p1305_p5)
}
 0x3fb   : > { %s1309_s22 = scalar_lea.hbm %s1760_s18, 128  ;;  %s1313_s15 = scalar_lea.hbm %s1848_s7, 256 }
 0x3fc   : > { %p1310_p10 = scmp.ne.s32.totalorder %s1760_s18, %s1309_s22  ;;  %p1314_p7 = scmp.lt.u32.totalorder %s1760_s18, %s1848_s7 }
 0x3fd   : > { %p1315_p3 = scmp.lt.u32.totalorder %s1313_s15, %s1309_s22  ;;  %p1317_p1 = scmp.lt.u32.totalorder %s1309_s22, %s1760_s18 }
 0x3fe   : > { %p1311_p13 = pnand %p1310_p10, %p1596_p8 }
 0x3ff   : > { %p1316_p11 = por %p1315_p3, %p1314_p7 }
 0x400   : > { %p1312_p9 = pneg %p1311_p13 }
 0x401   : > { %p1318_p4 = por %p1317_p1, %p1316_p11 }
 0x403   : > { %p1319_p2 = pnand %p1318_p4, %p1312_p9 }
 0x405   : > { %1322 = shalt.err (!%p1319_p2)
}
 0x406   : > { %1111 = dma.vmem_to_hbm [thread:$0]  (%p1596_p8), %s1762_s28, 128, %s1760_s18, %s843_s21   ;;  %vm807_vm13 = vcmask 57344  }
 0x407   : > { %s1023_s14 = sshll.u32 %s1648_s27, 1  ;;  %s1054_s24 = sshll.u32 %s1405_s10, 5 }
 0x408   : > { %s383_s19 = scalar_lea.vmem [#allocation10], %s1023_s14  ;;  %s1792_s20 = scalar_lea.hbm %s1849_s8, %s1054_s24 }
 0x409   : > { %s876_s26 = sshll.u32 %s383_s19, 4  ;;  %s848_s28 = scalar_lea.sflag [#allocation11], %s1648_s27  ;;  %s1794_s26 = int_to_ptr.vmem [resolvable:$true] %s876_s26 }
 0x40a   : > { %s1323_s18 = scalar_lea.vmem %s1794_s26, 32  ;;  %s1421_s10 = smov [#allocation10]  }
 0x40b   : > { %p1324_p6 = scmp.ne.s32.totalorder %s1794_s26, %s1323_s18  ;;  %s1327_s21 = sshll.u32 %s1421_s10, 4  ;;  %s1328_s21 = int_to_ptr.vmem [resolvable:$false] %s1327_s21 }
 0x40c   : > { %s1329_s15 = scalar_lea.vmem %s1328_s21, 64  ;;  %p1330_p5 = scmp.lt.s32.totalorder %s1794_s26, %s1328_s21 }
 0x40d   : > { %p1325_p12 = pnand %p1324_p6, %p1596_p8  ;;  %p1331_p10 = scmp.lt.s32.totalorder %s1329_s15, %s1323_s18 }
 0x40f   : > { %p1326_p0 = pneg %p1325_p12  ;;  %p1332_p13 = por %p1331_p10, %p1330_p5 }
 0x411   : > { %p1333_p9 = pnand %p1332_p13, %p1326_p0 }
 0x452   : > { %v825_v12 = vpop.trf.xlu1 }
 0x453   : > { %841 = vst.msk [vmem:[%s383_s19 + $0x1] sm:$0x1] %vm807_vm13, %v825_v12 }
 0x458   : > { %v791_v26 = vpop.trf.xlu0 }
 0x459   : > { %808 = vst.msk [vmem:[%s383_s19] sm:$0x1] %vm807_vm13, %v791_v26 }
 0x45a   : > { %1336 = shalt.err (!%p1333_p9)
}
 0x45b   : > { %s1337_s27 = scalar_lea.hbm %s1792_s20, 32  ;;  %s1341_s14 = scalar_lea.hbm %s1849_s8, 64 }
 0x45c   : > { %p1338_p7 = scmp.ne.s32.totalorder %s1792_s20, %s1337_s27  ;;  %p1342_p1 = scmp.lt.u32.totalorder %s1792_s20, %s1849_s8 }
 0x45d   : > { %p1343_p4 = scmp.lt.u32.totalorder %s1341_s14, %s1337_s27  ;;  %p1345_p6 = scmp.lt.u32.totalorder %s1337_s27, %s1792_s20 }
 0x45e   : > { %p1339_p3 = pnand %p1338_p7, %p1596_p8 }
 0x45f   : > { %p1344_p2 = por %p1343_p4, %p1342_p1 }
 0x460   : > { %p1340_p11 = pneg %p1339_p3 }
 0x461   : > { %p1346_p12 = por %p1345_p6, %p1344_p2 }
 0x463   : > { %p1347_p0 = pnand %p1346_p12, %p1340_p11 }
 0x465   : > { %1350 = shalt.err (!%p1347_p0)
}
 0x466   : > { %1112 = dma.vmem_to_hbm [thread:$0]  (%p1596_p8), %s1794_s26, 32, %s1792_s20, %s848_s28  }
 0x467 PF: > { %s888_s22 = sand.u32 1, %s1393_s29   ;;  %p1868_p5 = scmp.ne.s32.totalorder %s1858_s17, 0 }
 0x468   : > { %p1869_p10 = scmp.ge.s32.totalorder %s1413_s12, 2  ;;  %s889_s6 = scalar_lea.sflag [#allocation5], %s888_s22 }
 0x46a   : > { %p1127_p13 = pnand %p1869_p10, %p1868_p5 }
 0x46c   : > { %1384 = dma.done.wait (!%p1127_p13), %s889_s6, 128  }
 0x46d   : > { %1386 = vsyncadd (!%p1127_p13), %s889_s6, 4294967168  ;;  %s898_s18 = scalar_lea.sflag [#allocation11], %s888_s22 }
 0x46e   : > { %1388 = dma.done.wait (!%p1127_p13), %s898_s18, 32  }
 0x46f   : > { %1390 = vsyncadd (!%p1127_p13), %s898_s18, 4294967264  ;;  %s30_s12 = sadd.s32 1, %s1413_s12   ;;  %s1870_s29 = smov %s1397_s30 }
 0x470   : > { %p27_p9 = scmp.ge.s32.totalorder %s30_s12, 4   ;;  %s1871_s30 = smov %s1401_s9 }
 0x471   : > { %s1872_s9 = smov %s1605_s13  ;;  %s1873_s10 = smov %s1409_s11 }
 0x472   : > { %s1874_s11 = smov %s1876_s25  ;;  %29 = sbr.rel (!%p27_p9) target bundleno = 12 (0xc), region = 119 }
 0x479   :  { %903 = vsyncpa [#allocation4], 1 }
 0x47a   :  { %905 = vsyncpa [#allocation4 + $0x1], 1 }
 0x47b   :  { %906 = vsyncpa [#allocation7], 1 }
 0x47c   :  { %907 = vsyncpa [#allocation5], 1 }
 0x47d   :  { %909 = vsyncpa [#allocation5 + $0x1], 1 }
 0x47e   :  { %910 = vsyncpa [#allocation11], 1 }
 0x47f   :  { %912 = vsyncpa [#allocation11 + $0x1], 1 }

</bundles_post_ra>
